<compile_context>
chip_gen: v7x
topology: tpu7x:2x2x1
jax: 0.10.0
libtpu: 0.0.40
codegen_flags: <defaults>
</compile_context>

<pallas_src>
import jax
import jax.numpy as jnp
from jax import lax
from jax.experimental import pallas as pl
from jax.experimental.pallas import tpu as pltpu


def _round_hidden(hidden_dim, multiple_of=256):
    hidden_dim = int(2 * hidden_dim / 3)
    return multiple_of * ((hidden_dim + multiple_of - 1) // multiple_of)


def _round_up(x, m):
    return ((x + m - 1) // m) * m


def _device_defaults():
    """Generation-aware tile / VMEM defaults."""
    try:
        kind = jax.devices()[0].device_kind.lower()
    except Exception:
        kind = ""
    if "v7" in kind or "7x" in kind:
        # v7x: 64 MiB physical VMEM per TensorCore -> conservative budget,
        # smaller hidden tile, and force >=2 M tiles to feed both cores.
        return dict(tm=512, th=256, vmem_limit=56 * 1024 * 1024, min_m_tiles=2)
    if "v6" in kind:
        return dict(tm=512, th=512, vmem_limit=100 * 1024 * 1024, min_m_tiles=1)
    if "v5e" in kind or "v5 lite" in kind or "v5litepod" in kind:
        return dict(tm=512, th=512, vmem_limit=100 * 1024 * 1024, min_m_tiles=1)
    # Unknown generation: safe middle ground.
    return dict(tm=512, th=256, vmem_limit=64 * 1024 * 1024, min_m_tiles=1)


def prepare_swiglu_weights(w1, w3, w2, *, th=None, compute_dtype=jnp.bfloat16):
    """One-time weight prep (do this at model build / load time).

    w1, w3: (hidden, dim)   -- nn.Linear weight layout
    w2:     (dim, hidden)
    Returns a params dict with:
      w13: (2, Hp, dim) bf16 stacked w1/w3 (one DMA stream)
      w2t: (Hp, dim)    bf16 pre-transposed w2 (contiguous row tiles)
    where Hp = hidden zero-padded up to a multiple of the hidden tile.
    """
    defaults = _device_defaults()
    if th is None:
        th = defaults["th"]
    H, D = w1.shape
    th_eff = int(min(th, _round_up(H, 128)))
    Hp = _round_up(H, th_eff)

    w13 = jnp.stack([w1, w3], axis=0).astype(compute_dtype)   # (2, H, D)
    w2t = jnp.transpose(w2).astype(compute_dtype)              # (H, D)
    if Hp != H:
        # Zero hidden rows -> h1 = h3 = 0 -> silu(0) * 0 = 0 -> no contribution.
        w13 = jnp.pad(w13, ((0, 0), (0, Hp - H), (0, 0)))
        w2t = jnp.pad(w2t, ((0, Hp - H), (0, 0)))

    return {"w13": w13, "w2t": w2t, "th": th_eff, "dim": int(D),
            "compute_dtype": compute_dtype}


def _partial_out(x_ref, w13_ref, w2t_ref):
    """One (tm, D) f32 partial: W2_blk( silu(W1_blk x) * W3_blk x )."""
    x = x_ref[...]                                           # (tm, D) bf16
    dn_tr = (((1,), (1,)), ((), ()))                         # contract feature dims
    h1 = lax.dot_general(x, w13_ref[0], dn_tr,
                         preferred_element_type=jnp.float32)  # (tm, th)
    h3 = lax.dot_general(x, w13_ref[1], dn_tr,
                         preferred_element_type=jnp.float32)  # (tm, th)
    # silu(h1) = h1 * sigmoid(h1); exp on the EUP + approx reciprocal keeps
    # the VALU slots free (no vector divide).  f32 throughout (v5e safe).
    sig = pl.reciprocal(1.0 + jnp.exp(-h1), approx=True)
    g = (h1 * sig) * h3                                       # (tm, th) f32
    # (tm, th) x (th, D): canonical (M,K)x(K,N) with the pre-transposed w2.
    return lax.dot_general(g.astype(w2t_ref.dtype), w2t_ref[...],
                           (((1,), (0,)), ((), ())),
                           preferred_element_type=jnp.float32)  # (tm, D)


def swiglu_kernel_accum_out(x_ref, w13_ref, w2t_ref, o_ref):
    """f32 output path: accumulate directly into the resident output block."""
    j = pl.program_id(1)

    @pl.when(j == 0)
    def _():
        o_ref[...] = jnp.zeros_like(o_ref)

    o_ref[...] += _partial_out(x_ref, w13_ref, w2t_ref)


def swiglu_kernel_scratch(x_ref, w13_ref, w2t_ref, o_ref, acc_ref):
    """Non-f32 output path: f32 VMEM accumulator, cast on the last step."""
    j = pl.program_id(1)

    @pl.when(j == 0)
    def _():
        acc_ref[...] = jnp.zeros_like(acc_ref)

    acc_ref[...] += _partial_out(x_ref, w13_ref, w2t_ref)

    @pl.when(j == pl.num_programs(1) - 1)
    def _():
        o_ref[...] = acc_ref[...].astype(o_ref.dtype)


def swiglu_pallas(x, params, *, tm=None, out_dtype=None, vmem_limit_bytes=None):
    """x: (..., dim); params from prepare_swiglu_weights."""
    defaults = _device_defaults()
    if tm is None:
        tm = defaults["tm"]
    if vmem_limit_bytes is None:
        vmem_limit_bytes = defaults["vmem_limit"]

    w13, w2t, th = params["w13"], params["w2t"], params["th"]
    compute_dtype = params["compute_dtype"]
    Hp, D = w2t.shape
    assert D % 128 == 0, "feature dim must be a multiple of 128"
    assert x.shape[-1] == D, "input feature dim mismatch"
    assert Hp % th == 0  # guaranteed by prepare_swiglu_weights

    orig_shape = x.shape
    x2d = x.reshape(-1, D)
    M = x2d.shape[0]
    if out_dtype is None:
        out_dtype = x.dtype

    # Balanced token tiling: pick the tile count first, then size the tile to
    # minimize padding waste (multiple of 16 for bf16 sublane packing).  On
    # v7x force >= 2 M tiles so the "parallel" axis feeds both TensorCores.
    n_m = max(1, -(-M // tm))
    if defaults["min_m_tiles"] > n_m and M > 16:
        n_m = defaults["min_m_tiles"]
    tm_eff = _round_up(-(-M // n_m), 16)
    M_pad = tm_eff * n_m

    if M_pad != M:
        x2d = jnp.pad(x2d, ((0, M_pad - M), (0, 0)))
    xc = x2d.astype(compute_dtype)   # only the activations are cast per call

    grid = (M_pad // tm_eff, Hp // th)

    # Advisory cost estimate for the XLA scheduler.
    w_bytes = jnp.dtype(compute_dtype).itemsize
    o_bytes = jnp.dtype(out_dtype).itemsize
    cost = pl.CostEstimate(
        flops=int(6 * M_pad * D * Hp),
        transcendentals=int(M_pad * Hp),
        bytes_accessed=int(M_pad * D * w_bytes          # activations in
                           + M_pad * D * o_bytes        # output
                           + 3 * Hp * D * w_bytes * grid[0]),  # weight stream / M-tile
    )

    in_specs = [
        pl.BlockSpec((tm_eff, D), lambda i, j: (i, 0)),    # x tile
        pl.BlockSpec((2, th, D), lambda i, j: (0, j, 0)),  # stacked w1/w3 rows
        pl.BlockSpec((th, D), lambda i, j: (j, 0)),        # w2^T rows (contiguous)
    ]
    out_spec = pl.BlockSpec((tm_eff, D), lambda i, j: (i, 0))

    accumulate_in_out = jnp.dtype(out_dtype) == jnp.dtype(jnp.float32)
    kernel = swiglu_kernel_accum_out if accumulate_in_out else swiglu_kernel_scratch
    scratch = [] if accumulate_in_out else [pltpu.VMEM((tm_eff, D), jnp.float32)]

    out = pl.pallas_call(
        kernel,
        out_shape=jax.ShapeDtypeStruct((M_pad, D), out_dtype),
        grid_spec=pltpu.PrefetchScalarGridSpec(
            num_scalar_prefetch=0,
            grid=grid,
            in_specs=in_specs,
            out_specs=out_spec,
            scratch_shapes=scratch,
        ),
        compiler_params=pltpu.CompilerParams(
            dimension_semantics=("parallel", "arbitrary"),
            vmem_limit_bytes=int(vmem_limit_bytes),
        ),
        cost_estimate=cost,
    )(xc, w13, w2t)

    if M_pad != M:
        out = out[:M]
    return out.reshape(orig_shape)


if __name__ == "__main__":
    # Module config: dim=128, hidden_dim=256 -> rounded hidden = 256
    dim = 128
    hidden_cfg = 256
    hidden = _round_hidden(hidden_cfg, multiple_of=256)  # = 256

    batch, seq = 2, 8
    key = jax.random.PRNGKey(0)
    kx, k1, k2, k3 = jax.random.split(key, 4)

    x = jax.random.normal(kx, (batch, seq, dim), dtype=jnp.float32)
    # nn.Linear weight shapes: w1, w3: (hidden, dim); w2: (dim, hidden)
    w1 = jax.random.normal(k1, (hidden, dim), dtype=jnp.float32) * 0.02
    w3 = jax.random.normal(k3, (hidden, dim), dtype=jnp.float32) * 0.02
    w2 = jax.random.normal(k2, (dim, hidden), dtype=jnp.float32) * 0.02

    # One-time weight prep (bf16 cast, stack, transpose) -- hoisted out of the
    # per-call path exactly as a model would do at load time.
    params = prepare_swiglu_weights(w1, w3, w2)

    out = swiglu_pallas(x, params)
    out = jax.block_until_ready(out)

    # Reference mirroring the kernel numerics (bf16 matmul operands, f32
    # accumulation / gating; the in-kernel approx-reciprocal sigmoid only adds
    # sub-1e-3 relative error to the gate).
    cd = jnp.bfloat16
    xb, w1b, w3b, w2b = (a.astype(cd) for a in (x, w1, w3, w2))
    h1 = jnp.dot(xb, w1b.T, preferred_element_type=jnp.float32)
    h3 = jnp.dot(xb, w3b.T, preferred_element_type=jnp.float32)
    g = (jax.nn.silu(h1) * h3).astype(cd)
    ref = jnp.dot(g, w2b.T, preferred_element_type=jnp.float32).astype(x.dtype)
    assert jnp.allclose(out, ref, atol=2e-3, rtol=2e-2), "mismatch vs bf16 reference"

    # Sanity check against the pure-f32 PyTorch semantics (looser tolerance
    # accounts for bf16 operand rounding).
    ref_f32 = (jax.nn.silu(x @ w1.T) * (x @ w3.T)) @ w2.T
    assert jnp.allclose(out, ref_f32, atol=5e-3, rtol=5e-2), "mismatch vs f32 reference"

    print("KERNEL_OK")
</pallas_src>

<mosaic_0001>
module attributes {stable_mosaic.version = 11 : i64} {
  func.func @swiglu_kernel_accum_out(%arg0: i32, %arg1: i32, %arg2: memref<16x128xbf16, #tpu.memory_space<vmem>>, %arg3: memref<2x256x128xbf16, #tpu.memory_space<vmem>>, %arg4: memref<256x128xbf16, #tpu.memory_space<vmem>>, %arg5: memref<16x128xf32, #tpu.memory_space<vmem>>) attributes {dimension_semantics = [#tpu.dimension_semantics<parallel>, #tpu.dimension_semantics<arbitrary>], iteration_bounds = array<i64: 1, 1>, scalar_prefetch = 0 : i64, scratch_operands = 0 : i64, tpu.core_type = #tpu.core_type<tc>, window_params = [{transform_indices = @transform_0, window_bounds = array<i64: 16, 128>}, {transform_indices = @transform_1, window_bounds = array<i64: 2, 256, 128>}, {transform_indices = @transform_2, window_bounds = array<i64: 256, 128>}, {transform_indices = @transform_3, window_bounds = array<i64: 16, 128>}]} {
    %c0_i32 = arith.constant 0 : i32
    %0 = arith.cmpi eq, %arg1, %c0_i32 : i32
    %1 = arith.extui %0 : i1 to i32
    %c0_i32_0 = arith.constant 0 : i32
    %2 = arith.cmpi ne, %1, %c0_i32_0 : i32
    scf.if %2 {
      %cst_17 = arith.constant 0.000000e+00 : f32
      %24 = vector.broadcast %cst_17 : f32 to vector<16x128xf32>
      %c0_18 = arith.constant 0 : index
      %c0_19 = arith.constant 0 : index
      %25 = vector.load %arg5[%c0_18, %c0_19] : memref<16x128xf32, #tpu.memory_space<vmem>>, vector<16x128xf32>
      tpu.vector_store %arg5[%c0_18, %c0_19], %24 {strides = array<i32>} : memref<16x128xf32, #tpu.memory_space<vmem>>, vector<16x128xf32>,
    } else {
    }
    %c0 = arith.constant 0 : index
    %c0_1 = arith.constant 0 : index
    %3 = vector.load %arg5[%c0, %c0_1] : memref<16x128xf32, #tpu.memory_space<vmem>>, vector<16x128xf32>
    %c0_2 = arith.constant 0 : index
    %c0_3 = arith.constant 0 : index
    %4 = vector.load %arg2[%c0_2, %c0_3] : memref<16x128xbf16, #tpu.memory_space<vmem>>, vector<16x128xbf16>
    %c0_4 = arith.constant 0 : index
    %c0_5 = arith.constant 0 : index
    %c0_6 = arith.constant 0 : index
    %5 = vector.load %arg3[%c0_4, %c0_5, %c0_6] : memref<2x256x128xbf16, #tpu.memory_space<vmem>>, vector<1x256x128xbf16>
    %6 = vector.shape_cast %5 : vector<1x256x128xbf16> to vector<256x128xbf16>
    %cst = arith.constant dense<0.000000e+00> : vector<16x256xf32>
    %7 = tpu.matmul %4, %6, %cst {dimension_numbers = #tpu.dot_dimension_numbers<[1], [1], [0], [0], [0, 0, 1, 0], [], []>} : vector<16x128xbf16>, vector<256x128xbf16>, vector<16x256xf32> -> vector<16x256xf32>
    %c1 = arith.constant 1 : index
    %c0_7 = arith.constant 0 : index
    %c0_8 = arith.constant 0 : index
    %8 = vector.load %arg3[%c1, %c0_7, %c0_8] : memref<2x256x128xbf16, #tpu.memory_space<vmem>>, vector<1x256x128xbf16>
    %9 = vector.shape_cast %8 : vector<1x256x128xbf16> to vector<256x128xbf16>
    %cst_9 = arith.constant dense<0.000000e+00> : vector<16x256xf32>
    %10 = tpu.matmul %4, %9, %cst_9 {dimension_numbers = #tpu.dot_dimension_numbers<[1], [1], [0], [0], [0, 0, 1, 0], [], []>} : vector<16x128xbf16>, vector<256x128xbf16>, vector<16x256xf32> -> vector<16x256xf32>
    %cst_10 = arith.constant 0.000000e+00 : f32
    %11 = vector.broadcast %cst_10 : f32 to vector<16x256xf32>
    %12 = arith.subf %11, %7 : vector<16x256xf32>
    %13 = math.exp %12 : vector<16x256xf32>
    %cst_11 = arith.constant 1.000000e+00 : f32
    %14 = vector.broadcast %cst_11 : f32 to vector<16x256xf32>
    %15 = arith.addf %14, %13 : vector<16x256xf32>
    %16 = tpu.reciprocal %15 {approx = true} : vector<16x256xf32> -> vector<16x256xf32>
    %17 = arith.mulf %7, %16 : vector<16x256xf32>
    %18 = arith.mulf %17, %10 : vector<16x256xf32>
    %19 = arith.truncf %18 : vector<16x256xf32> to vector<16x256xbf16>
    %c0_12 = arith.constant 0 : index
    %c0_13 = arith.constant 0 : index
    %20 = vector.load %arg4[%c0_12, %c0_13] : memref<256x128xbf16, #tpu.memory_space<vmem>>, vector<256x128xbf16>
    %cst_14 = arith.constant dense<0.000000e+00> : vector<16x128xf32>
    %21 = tpu.matmul %19, %20, %cst_14 {dimension_numbers = #tpu.dot_dimension_numbers<[1], [0], [0], [1], [0, 0, 1, 1], [], []>} : vector<16x256xbf16>, vector<256x128xbf16>, vector<16x128xf32> -> vector<16x128xf32>
    %22 = arith.addf %3, %21 : vector<16x128xf32>
    %c0_15 = arith.constant 0 : index
    %c0_16 = arith.constant 0 : index
    %23 = vector.load %arg5[%c0_15, %c0_16] : memref<16x128xf32, #tpu.memory_space<vmem>>, vector<16x128xf32>
    tpu.vector_store %arg5[%c0_15, %c0_16], %22 {strides = array<i32>} : memref<16x128xf32, #tpu.memory_space<vmem>>, vector<16x128xf32>,
    return
  }
  func.func @transform_0(%arg0: i32, %arg1: i32) -> (i32, i32) {
    %c0_i32 = arith.constant 0 : i32
    %c0_i32_0 = arith.constant 0 : i32
    return %arg0, %c0_i32 : i32, i32
  }
  func.func @transform_1(%arg0: i32, %arg1: i32) -> (i32, i32, i32) {
    %c0_i32 = arith.constant 0 : i32
    %c0_i32_0 = arith.constant 0 : i32
    %c0_i32_1 = arith.constant 0 : i32
    return %c0_i32, %arg1, %c0_i32_0 : i32, i32, i32
  }
  func.func @transform_2(%arg0: i32, %arg1: i32) -> (i32, i32) {
    %c0_i32 = arith.constant 0 : i32
    %c0_i32_0 = arith.constant 0 : i32
    return %arg1, %c0_i32 : i32, i32
  }
  func.func @transform_3(%arg0: i32, %arg1: i32) -> (i32, i32) {
    %c0_i32 = arith.constant 0 : i32
    %c0_i32_0 = arith.constant 0 : i32
    return %arg0, %c0_i32 : i32, i32
  }
}

</mosaic_0001>

<bundles_post_ra>
// kernel: tpu_custom_call.1
= control target key start
LH: loop header
LB: loop body
LE: loop exit
PB: predicated region body
PF: predicated region fallthrough
CT: control target
= control target key end

     0   :  { %8 = vsyncpa [#allocation3], 0  ;;  %s1004_s0 = inlined_call_operand.hbm [shape: bf16[16,128], index: 0, kind: input, shape index: {}]   ;;  %s1005_s1 = inlined_call_operand.hbm [shape: bf16[2,256,128], index: 1, kind: input, shape index: {}]   ;;  %s1006_s2 = inlined_call_operand.hbm [shape: bf16[256,128], index: 2, kind: input, shape index: {}]   ;;  %s1007_s3 = inlined_call_operand.hbm [shape: f32[16,128], index: 3, kind: output, shape index: {}]  }
   0x1   :  { %9 = vsyncpa [#allocation6], 0 }
   0x2   :  { %10 = vsyncpa [#allocation4], 0  ;;  %s912_s12 = smov [#allocation5]   ;;  %s913_s14 = smov [#allocation2]  }
   0x3   :  { %s28_s13 = sshll.u32 %s912_s12, 4  ;;  %s16_s15 = sshll.u32 %s913_s14, 4  ;;  %s29_s13 = int_to_ptr.vmem [resolvable:$true] %s28_s13  ;;  %s940_s15 = int_to_ptr.vmem [resolvable:$true] %s16_s15 }
   0x4   :  { %s818_s18 = scalar_lea.hbm %s1005_s1, 4096 }
   0x5   :  { %p819_p0 = scmp.ne.s32.totalorder %s1005_s1, %s818_s18  ;;  %p822_p1 = scmp.lt.u32.totalorder %s818_s18, %s1005_s1 }
   0x7   :  { %p824_p2 = pnand %p822_p1, %p819_p0 }
   0x9   :  { %827 = shalt.err (!%p824_p2)
}
   0xa   :  { %s828_s23 = scalar_lea.vmem %s29_s13, 4096  ;;  %p833_p4 = scmp.lt.s32.totalorder %s29_s13, %s29_s13 }
   0xb   :  { %p829_p3 = scmp.ne.s32.totalorder %s29_s13, %s828_s23  ;;  %p834_p5 = scmp.lt.s32.totalorder %s828_s23, %s828_s23 }
   0xd   :  { %p835_p6 = por %p834_p5, %p833_p4 }
   0xf   :  { %p836_p7 = pnand %p835_p6, %p829_p3 }
  0x11   :  { %839 = shalt.err (!%p836_p7)
}
  0x12   :  { %s914_s24 = smov 64   ;;  %s915_s25 = smov 4  }
  0x13   :  { %34 = dma.hbm_to_vmem [thread:$0]  %s1005_s1, 4096, %s29_s13, [#allocation6], %s914_s24, %s914_s24, %s915_s25  }
  0x14   :  { %s840_s30 = scalar_lea.hbm %s1004_s0, 128 }
  0x15   :  { %p841_p8 = scmp.ne.s32.totalorder %s1004_s0, %s840_s30  ;;  %p844_p9 = scmp.lt.u32.totalorder %s840_s30, %s1004_s0 }
  0x17   :  { %p846_p10 = pnand %p844_p9, %p841_p8 }
  0x19   :  { %849 = shalt.err (!%p846_p10)
}
  0x1a   :  { %s850_s8 = scalar_lea.vmem %s940_s15, 128  ;;  %p855_p12 = scmp.lt.s32.totalorder %s940_s15, %s940_s15 }
  0x1b   :  { %p851_p11 = scmp.ne.s32.totalorder %s940_s15, %s850_s8  ;;  %p856_p13 = scmp.lt.s32.totalorder %s850_s8, %s850_s8 }
  0x1d   :  { %p857_p0 = por %p856_p13, %p855_p12 }
  0x1f   :  { %p858_p1 = pnand %p857_p0, %p851_p11 }
  0x21   :  { %861 = shalt.err (!%p858_p1)
}
  0x22   :  { %22 = dma.hbm_to_vmem [thread:$0]  %s1004_s0, 128, %s940_s15, [#allocation3], %s914_s24, %s914_s24, %s915_s25  }
  0x23   :  { %s916_s10 = smov [#allocation7]   ;;  %s862_s14 = scalar_lea.hbm %s1006_s2, 2048 }
  0x24   :  { %s40_s11 = sshll.u32 %s916_s10, 4  ;;  %p863_p2 = scmp.ne.s32.totalorder %s1006_s2, %s862_s14  ;;  %s41_s11 = int_to_ptr.vmem [resolvable:$true] %s40_s11 }
  0x25   :  { %p866_p3 = scmp.lt.u32.totalorder %s862_s14, %s1006_s2 }
  0x27   :  { %p868_p4 = pnand %p866_p3, %p863_p2 }
  0x29   :  { %871 = shalt.err (!%p868_p4)
}
  0x2a   :  { %s872_s20 = scalar_lea.vmem %s41_s11, 2048  ;;  %p877_p6 = scmp.lt.s32.totalorder %s41_s11, %s41_s11 }
  0x2b   :  { %p873_p5 = scmp.ne.s32.totalorder %s41_s11, %s872_s20  ;;  %p878_p7 = scmp.lt.s32.totalorder %s872_s20, %s872_s20 }
  0x2d   :  { %p879_p8 = por %p878_p7, %p877_p6 }
  0x2f   :  { %p880_p9 = pnand %p879_p8, %p873_p5 }
  0x31   :  { %883 = shalt.err (!%p880_p9)
}
  0x32   :  { %46 = dma.hbm_to_vmem [thread:$0]  %s1006_s2, 2048, %s41_s11, [#allocation6], %s914_s24, %s914_s24, %s915_s25  }
  0x33   :  { %906 = dma.done.wait [#allocation3], 128  }
  0x34   :  { %907 = vsyncadd [#allocation3], 4294967168 }
  0x35   :  { %908 = dma.done.wait [#allocation6], 6144  }
  0x36   :  { %909 = vsyncadd [#allocation6], 4294961152  ;;  %v753_v0 = vld [vmem:[#allocation5 + $0x40] sm:$0xff]   ;;  %v755_v2 = vld [vmem:[#allocation5 + $0x48] sm:$0xff]   ;;  %s917_s2 = smov [#allocation8]  }
  0x37   :  { %v754_v1 = vld [vmem:[#allocation5] sm:$0xff]   ;;  %686 = vmatprep.subr.bf16.mxu0 %v753_v0  ;;  %v756_v3 = vld [vmem:[#allocation5 + $0x8] sm:$0xff]   ;;  %v757_v4 = vld [vmem:[#allocation5 + $0x50] sm:$0xff]   ;;  %s624_s21 = sshll.u32 %s917_s2, 4  ;;  %s625_s21 = int_to_ptr.vmem [resolvable:$true] %s624_s21 }
  0x38   :  { %687 = vmatpush3.bf16.xpose.msra.mxu0 %v754_v1  ;;  %v761_v5 = vld [vmem:[#allocation5 + $0xc0] sm:$0xff]   ;;  %v765_v7 = vld [vmem:[#allocation5 + $0xc8] sm:$0xff]   ;;  %v758_v8 = vld [vmem:[#allocation5 + $0x10] sm:$0xff]   ;;  %s884_s22 = scalar_lea.vmem %s625_s21, 256  ;;  %p889_p11 = scmp.lt.s32.totalorder %s625_s21, %s625_s21 }
  0x39   :  { %688 = vmatprep.subr.bf16.mxu0 %v755_v2  ;;  %v762_v6 = vld [vmem:[#allocation5 + $0x80] sm:$0xff]   ;;  %704 = vmatprep.subr.bf16.mxu1 %v761_v5  ;;  %v759_v9 = vld [vmem:[#allocation5 + $0x58] sm:$0xff]   ;;  %v766_v10 = vld [vmem:[#allocation5 + $0x88] sm:$0xff]   ;;  %p885_p10 = scmp.ne.s32.totalorder %s625_s21, %s884_s22  ;;  %p890_p12 = scmp.lt.s32.totalorder %s884_s22, %s884_s22 }
  0x3a   :  { %705 = vmatpush3.bf16.xpose.msra.mxu1 %v762_v6  ;;  %v769_v11 = vld [vmem:[#allocation5 + $0xd0] sm:$0xff]   ;;  %v760_v12 = vld [vmem:[#allocation5 + $0x18] sm:$0xff]   ;;  %v763_v13 = vld [vmem:[#allocation5 + $0x60] sm:$0xff]  }
  0x3b   :  { %706 = vmatprep.subr.bf16.mxu1 %v765_v7  ;;  %v770_v14 = vld [vmem:[#allocation5 + $0x90] sm:$0xff]   ;;  %v773_v15 = vld [vmem:[#allocation5 + $0xd8] sm:$0xff]   ;;  %v764_v17 = vld [vmem:[#allocation5 + $0x20] sm:$0xff]   ;;  %p891_p13 = por %p890_p12, %p889_p11 }
  0x3c   :  { %v779_v16 = vld [vmem:[#allocation2] sm:$0xff]   ;;  %v767_v18 = vld [vmem:[#allocation5 + $0x68] sm:$0xff]   ;;  %v777_v20 = vld [vmem:[#allocation5 + $0xe0] sm:$0xff]  }
  0x3d   :  { %702 = vmatprep.mubr.bf16.mxu0 %v779_v16  ;;  %720 = vmatprep.mubr.bf16.mxu1 %v779_v16  ;;  %v774_v19 = vld [vmem:[#allocation5 + $0x98] sm:$0xff]   ;;  %v768_v21 = vld [vmem:[#allocation5 + $0x28] sm:$0xff]   ;;  %v778_v22 = vld [vmem:[#allocation5 + $0xa0] sm:$0xff]   ;;  %p892_p0 = pnand %p891_p13, %p885_p10 }
  0x3e   :  { %v771_v23 = vld [vmem:[#allocation5 + $0x70] sm:$0xff]   ;;  %v780_v24 = vld [vmem:[#allocation5 + $0xe8] sm:$0xff]   ;;  %v775_v27 = vld [vmem:[#allocation5 + $0x78] sm:$0xff]  }
  0x3f   :  { %v772_v25 = vld [vmem:[#allocation5 + $0x30] sm:$0xff]   ;;  %v781_v26 = vld [vmem:[#allocation5 + $0xa8] sm:$0xff]   ;;  %v776_v29 = vld [vmem:[#allocation5 + $0x38] sm:$0xff]  }
  0x40   :  { %689 = vmatpush3.bf16.xpose.msra.mxu0 %v756_v3  ;;  %v782_v28 = vld [vmem:[#allocation5 + $0xf0] sm:$0xff]   ;;  %v784_v31 = vld [vmem:[#allocation5 + $0xf8] sm:$0xff]   ;;  %v786_v33 = vld [vmem:[#allocation7 + $0x40] sm:$0xff]  }
  0x41   :  { %690 = vmatprep.subr.bf16.mxu0 %v757_v4  ;;  %v783_v30 = vld [vmem:[#allocation5 + $0xb0] sm:$0xff]   ;;  %v785_v32 = vld [vmem:[#allocation5 + $0xb8] sm:$0xff]   ;;  %v787_v34 = vld [vmem:[#allocation7] sm:$0xff]  }
  0x42   :  { %707 = vmatpush3.bf16.xpose.msra.mxu1 %v766_v10  ;;  %v788_v35 = vld [vmem:[#allocation7 + $0x48] sm:$0xff]   ;;  %v790_v37 = vld [vmem:[#allocation7 + $0x50] sm:$0xff]   ;;  %v792_v39 = vld [vmem:[#allocation7 + $0x58] sm:$0xff]  }
  0x43   :  { %708 = vmatprep.subr.bf16.mxu1 %v769_v11  ;;  %v789_v36 = vld [vmem:[#allocation7 + $0x8] sm:$0xff]   ;;  %v791_v38 = vld [vmem:[#allocation7 + $0x10] sm:$0xff]   ;;  %v793_v40 = vld [vmem:[#allocation7 + $0x18] sm:$0xff]  }
  0x44   :  { %v794_v41 = vld [vmem:[#allocation7 + $0x60] sm:$0xff]   ;;  %v796_v43 = vld [vmem:[#allocation7 + $0x68] sm:$0xff]   ;;  %v798_v45 = vld [vmem:[#allocation7 + $0x70] sm:$0xff]  }
  0x45   :  { %v795_v42 = vld [vmem:[#allocation7 + $0x20] sm:$0xff]   ;;  %v797_v44 = vld [vmem:[#allocation7 + $0x28] sm:$0xff]   ;;  %v799_v46 = vld [vmem:[#allocation7 + $0x30] sm:$0xff]  }
  0x46   :  { %v800_v47 = vld [vmem:[#allocation7 + $0x78] sm:$0xff]  }
  0x47   :  { %v801_v48 = vld [vmem:[#allocation7 + $0x38] sm:$0xff]  }
  0x48   :  { %691 = vmatpush3.bf16.xpose.msra.mxu0 %v758_v8 }
  0x49   :  { %692 = vmatprep.subr.bf16.mxu0 %v759_v9 }
  0x4a   :  { %709 = vmatpush3.bf16.xpose.msra.mxu1 %v770_v14 }
  0x4b   :  { %710 = vmatprep.subr.bf16.mxu1 %v773_v15 }
  0x50   :  { %693 = vmatpush3.bf16.xpose.msra.mxu0 %v760_v12 }
  0x51   :  { %694 = vmatprep.subr.bf16.mxu0 %v763_v13 }
  0x52   :  { %711 = vmatpush3.bf16.xpose.msra.mxu1 %v774_v19 }
  0x53   :  { %712 = vmatprep.subr.bf16.mxu1 %v777_v20 }
  0x58   :  { %695 = vmatpush3.bf16.xpose.msra.mxu0 %v764_v17 }
  0x59   :  { %696 = vmatprep.subr.bf16.mxu0 %v767_v18 }
  0x5a   :  { %713 = vmatpush3.bf16.xpose.msra.mxu1 %v778_v22 }
  0x5b   :  { %714 = vmatprep.subr.bf16.mxu1 %v780_v24 }
  0x60   :  { %697 = vmatpush3.bf16.xpose.msra.mxu0 %v768_v21 }
  0x61   :  { %698 = vmatprep.subr.bf16.mxu0 %v771_v23 }
  0x62   :  { %715 = vmatpush3.bf16.xpose.msra.mxu1 %v781_v26 }
  0x63   :  { %716 = vmatprep.subr.bf16.mxu1 %v782_v28 }
  0x68   :  { %699 = vmatpush3.bf16.xpose.msra.mxu0 %v772_v25 }
  0x69   :  { %700 = vmatprep.subr.bf16.mxu0 %v775_v27 }
  0x6a   :  { %717 = vmatpush3.bf16.xpose.msra.mxu1 %v783_v30 }
  0x6b   :  { %718 = vmatprep.subr.bf16.mxu1 %v784_v31 }
  0x70   :  { %701 = vmatpush3.bf16.xpose.msra.mxu0 %v776_v29 }
  0x71   :  { %722 = vmatprep.subr.bf16.mxu0 %v786_v33 }
  0x72   :  { %719 = vmatpush3.bf16.xpose.msra.mxu1 %v785_v32 }
  0x77   :  { %703 = vmatmul.mubr.bf16.vlgmr.msra.gmra.mrb[0].mxu0 %v779_v16 }
  0x78   :  { %723 = vmatpush3.bf16.msra.mxu0 %v787_v34 }
  0x79   :  { %721 = vmatmul.mubr.bf16.vlgmr.msra.gmra.mrb[0].mxu1 %v779_v16  ;;  %724 = vmatprep.subr.bf16.mxu0 %v788_v35 }
  0x7c   :  { %725 = vmatpush3.bf16.msra.mxu0 %v789_v36 }
  0x7d   :  { %726 = vmatprep.subr.bf16.mxu0 %v790_v37 }
  0x80   :  { %727 = vmatpush3.bf16.msra.mxu0 %v791_v38 }
  0x81   :  { %728 = vmatprep.subr.bf16.mxu0 %v792_v39 }
  0x84   :  { %729 = vmatpush3.bf16.msra.mxu0 %v793_v40 }
  0x85   :  { %730 = vmatprep.subr.bf16.mxu0 %v794_v41 }
  0x88   :  { %731 = vmatpush3.bf16.msra.mxu0 %v795_v42 }
  0x89   :  { %732 = vmatprep.subr.bf16.mxu0 %v796_v43 }
  0x8c   :  { %733 = vmatpush3.bf16.msra.mxu0 %v797_v44 }
  0x8d   :  { %734 = vmatprep.subr.bf16.mxu0 %v798_v45 }
  0x90   :  { %735 = vmatpush3.bf16.msra.mxu0 %v799_v46 }
  0x91   :  { %736 = vmatprep.subr.bf16.mxu0 %v800_v47 }
  0x94   :  { %737 = vmatpush3.bf16.msra.mxu0 %v801_v48 }
 0x14a   :  { %v235_v49 = vpop.f32.mrb[0].mxu0 }
 0x14b   :  { %v416_v50 = vsub.f32 0.0, %v235_v49  ;;  %v237_v51 = vpop.f32.mrb[1].mxu0 }
 0x14c   :  { %v417_v52 = vsub.f32 0.0, %v237_v51  ;;  %v239_v53 = vpop.f32.mrb[2].mxu0  ;;  %v407_v61 = vpop.f32.mrb[0].mxu1 }
 0x14d   :  { %v420_v54 = vmul.f32 1.442695, %v416_v50  ;;  %v418_v55 = vsub.f32 0.0, %v239_v53  ;;  %v241_v56 = vpop.f32.mrb[3].mxu0  ;;  %v409_v62 = vpop.f32.mrb[1].mxu1 }
 0x14e   :  { %v422_v57 = vmul.f32 1.442695, %v417_v52  ;;  %v419_v58 = vsub.f32 0.0, %v241_v56  ;;  %v411_v63 = vpop.f32.mrb[2].mxu1 }
 0x14f   :  { %802 = vpow2.f32 %v420_v54  ;;  %v424_v59 = vmul.f32 1.442695, %v418_v55  ;;  %v413_v0 = vpop.f32.mrb[3].mxu1 }
 0x150   :  { %804 = vpow2.f32 %v422_v57  ;;  %v426_v60 = vmul.f32 1.442695, %v419_v58 }
 0x151   :  { %806 = vpow2.f32 %v424_v59 }
 0x152   :  { %808 = vpow2.f32 %v426_v60 }
 0x159   :  { %v803_v1 = vpop.eup %802 }
 0x15a   :  { %v805_v2 = vpop.eup %804  ;;  %v428_v3 = vadd.f32 1.0, %v803_v1 }
 0x15b   :  { %v807_v4 = vpop.eup %806  ;;  %v429_v5 = vadd.f32 1.0, %v805_v2 }
 0x15c   :  { %v809_v6 = vpop.eup %808  ;;  %810 = vrcp.f32 %v428_v3  ;;  %v430_v7 = vadd.f32 1.0, %v807_v4 }
 0x15d   :  { %812 = vrcp.f32 %v429_v5  ;;  %v431_v8 = vadd.f32 1.0, %v809_v6 }
 0x15e   :  { %814 = vrcp.f32 %v430_v7 }
 0x15f   :  { %816 = vrcp.f32 %v431_v8 }
 0x166   :  { %v811_v9 = vpop.eup %810 }
 0x167   :  { %v813_v10 = vpop.eup %812  ;;  %v436_v11 = vmul.f32 %v811_v9, %v235_v49 }
 0x168   :  { %v815_v12 = vpop.eup %814  ;;  %v437_v13 = vmul.f32 %v813_v10, %v237_v51 }
 0x169   :  { %v817_v14 = vpop.eup %816  ;;  %v438_v15 = vmul.f32 %v815_v12, %v239_v53  ;;  %v440_v16 = vmul.f32 %v436_v11, %v407_v61 }
 0x16a   :  { %v439_v17 = vmul.f32 %v817_v14, %v241_v56  ;;  %v441_v18 = vmul.f32 %v437_v13, %v409_v62 }
 0x16b   :  { %v442_v19 = vmul.f32 %v438_v15, %v411_v63 }
 0x16c   :  { %v443_v20 = vmul.f32 %v439_v17, %v413_v0 }
 0x16d   :  { %v444_v21 = vpack.c.bf16 %v442_v19, %v440_v16 }
 0x16e   :  { %v445_v22 = vpack.c.bf16 %v443_v20, %v441_v18 }
 0x170   :  { %606 = vmatprep.mubr.bf16.mxu0 %v445_v22 }
 0x171   :  { %607 = vmatmul.mubr.bf16.vlgmr.msra.gmra.mrb[4].mxu0 %v444_v21 }
 0x244   :  { %v738_v23 = vpop.f32.mrb[4].mxu0 }
 0x245   :  { %v739_v24 = vpop.f32.mrb[5].mxu0 }
 0x246   :  { %v740_v25 = vadd.f32 %v739_v24, %v738_v23  ;;  %v741_v26 = vpop.f32.mrb[6].mxu0 }
 0x247   :  { %v742_v27 = vpop.f32.mrb[7].mxu0 }
 0x248   :  { %v743_v28 = vadd.f32 %v742_v27, %v741_v26  ;;  %617 = vst [vmem:[#allocation8] sm:$0xff] %v740_v25 }
 0x24a   :  { %618 = vst [vmem:[#allocation8 + $0x8] sm:$0xff] %v743_v28 }
 0x24b   :  { %895 = shalt.err (!%p892_p0)
}
 0x24c   :  { %s896_s25 = scalar_lea.hbm %s1007_s3, 256 }
 0x24d   :  { %p897_p1 = scmp.ne.s32.totalorder %s1007_s3, %s896_s25  ;;  %p900_p2 = scmp.lt.u32.totalorder %s896_s25, %s1007_s3 }
 0x24f   :  { %p902_p3 = pnand %p900_p2, %p897_p1 }
 0x251   :  { %905 = shalt.err (!%p902_p3)
}
 0x252   :  { %s918_s30 = smov 128   ;;  %s919_s4 = smov 8  }
 0x253   :  { %630 = dma.vmem_to_hbm [thread:$0]  %s625_s21, 256, %s1007_s3, [#allocation4], %s918_s30, %s918_s30, %s919_s4  }
 0x254   :  { %910 = dma.done.wait [#allocation4], 256  }
 0x255   :  { %911 = vsyncadd [#allocation4], 4294967040 }
 0x256   :  { %634 = vsyncpa [#allocation3], 1 }
 0x257   :  { %635 = vsyncpa [#allocation6], 1 }
 0x258   :  { %636 = vsyncpa [#allocation4], 1 }

</bundles_post_ra>
